<compile_context>
chip_gen: v6e
topology: v6e:2x2x1
jax: 0.10.0
libtpu: 0.0.40
codegen_flags: <defaults>
</compile_context>

<pallas_src>
import functools
import math

import jax
import jax.numpy as jnp
from jax import lax
from jax.experimental import pallas as pl
from jax.experimental.pallas import tpu as pltpu


def _encoder_kernel(qh_ref, qb_ref, kh_ref, kb_ref,      # inputs
                    local_ref, glob_ref,                 # outputs
                    m_ref, l_ref, acc_ref,               # VMEM scratch
                    *, scale):
    ki = pl.program_id(1)
    nk = pl.num_programs(1)

    local_q = qh_ref[...] + qb_ref[...]          # (TQ, H) f32, broadcast add
    local_k = kh_ref[...] + kb_ref[...]          # (TK, H) f32, broadcast add

    @pl.when(ki == 0)
    def _():
        m_ref[...] = jnp.full_like(m_ref, -jnp.inf)
        l_ref[...] = jnp.zeros_like(l_ref)
        acc_ref[...] = jnp.zeros_like(acc_ref)
        local_ref[...] = local_q                 # local half written once per q tile

    # bf16 MXU operands, f32 accumulation.  Scale folded into q.
    q_bf = (local_q * scale).astype(jnp.bfloat16)
    k_bf = local_k.astype(jnp.bfloat16)

    # scores = q @ k^T as a last-dim/last-dim contraction (transpose-free MXU feed)
    s = lax.dot_general(q_bf, k_bf,
                        dimension_numbers=(((1,), (1,)), ((), ())),
                        preferred_element_type=jnp.float32)          # (TQ, TK)

    m_prev = m_ref[...]
    m_new = jnp.maximum(m_prev, jnp.max(s, axis=-1, keepdims=True))  # (TQ, 1)
    alpha = jnp.exp(m_prev - m_new)                                  # (TQ, 1)
    p = jnp.exp(s - m_new)                                           # un-normalized
    l_ref[...] = alpha * l_ref[...] + jnp.sum(p, axis=-1, keepdims=True)
    acc_ref[...] = alpha * acc_ref[...] + jnp.dot(
        p.astype(jnp.bfloat16), k_bf, preferred_element_type=jnp.float32)
    m_ref[...] = m_new

    @pl.when(ki == nk - 1)
    def _():
        # normalize once on the (TQ, H) accumulator; reciprocal on the EUP slot
        glob_ref[...] = acc_ref[...] * pl.reciprocal(l_ref[...], approx=True)


def _pick_tile(n, pref):
    """Largest divisor of n that is <= pref and a multiple of 8 (else n itself)."""
    if n <= pref:
        return n
    t = (min(pref, n) // 8) * 8
    while t >= 8:
        if n % t == 0:
            return t
        t -= 8
    return n


def _vmem_limit_bytes(tq, tk, h):
    f32 = 4
    # double-buffered input tiles ((L,1) bias tiles are lane-padded to 128)
    inputs = 2 * (tq * h + tq * 128 + tk * h + tk * 128) * f32
    outputs = 2 * (2 * tq * h) * f32
    scratch = (tq * h + 2 * tq * 128) * f32
    temps = 6 * tq * tk * f32 + 6 * tq * h * f32   # scores/exp/bf16 working set
    est = inputs + outputs + scratch + temps
    # floor at the conservative v5e scoped default, cap well under v7x's 64 MiB
    return int(min(max(2 * est, 16 * 1024 * 1024), 48 * 1024 * 1024))


def local_global_encoder(hiddens, labels, predicted, bias1_w, bias2_w,
                         *, tq=256, tk=512):
    """hiddens: (L, H) f32, labels/predicted: (L,) int32,
    bias1_w: (action_size, 1), bias2_w: (2, 1).  Returns (L, 2H) f32."""
    L, H = hiddens.shape
    hiddens = hiddens.astype(jnp.float32)
    # Embedding lookups are tiny gathers -> done as JAX glue, pre-summed to one
    # (L, 1) bias input (halves the lane-padded (L,128) DMA traffic).
    combined_bias = (bias1_w[labels] + bias2_w[predicted]).astype(jnp.float32)

    TQ = _pick_tile(L, tq)
    TK = _pick_tile(L, tk)
    grid = (L // TQ, L // TK)
    scale = 1.0 / math.sqrt(float(H))

    kernel = functools.partial(_encoder_kernel, scale=scale)
    local_e, global_e = pl.pallas_call(
        kernel,
        out_shape=(jax.ShapeDtypeStruct((L, H), jnp.float32),
                   jax.ShapeDtypeStruct((L, H), jnp.float32)),
        grid_spec=pltpu.PrefetchScalarGridSpec(
            num_scalar_prefetch=0,
            grid=grid,
            in_specs=[
                pl.BlockSpec((TQ, H), lambda qi, ki: (qi, 0)),   # hiddens (q view)
                pl.BlockSpec((TQ, 1), lambda qi, ki: (qi, 0)),   # bias    (q view)
                pl.BlockSpec((TK, H), lambda qi, ki: (ki, 0)),   # hiddens (kv view)
                pl.BlockSpec((TK, 1), lambda qi, ki: (ki, 0)),   # bias    (kv view)
            ],
            out_specs=[
                pl.BlockSpec((TQ, H), lambda qi, ki: (qi, 0)),   # local_e
                pl.BlockSpec((TQ, H), lambda qi, ki: (qi, 0)),   # global_e
            ],
            scratch_shapes=[
                pltpu.VMEM((TQ, 1), jnp.float32),   # running max m
                pltpu.VMEM((TQ, 1), jnp.float32),   # running denom l
                pltpu.VMEM((TQ, H), jnp.float32),   # accumulator
            ]),
        compiler_params=pltpu.CompilerParams(
            dimension_semantics=("parallel", "arbitrary"),
            vmem_limit_bytes=_vmem_limit_bytes(TQ, TK, H)),
    )(hiddens, combined_bias, hiddens, combined_bias)

    # torch.cat([local_e, global_e], dim=1)
    return jnp.concatenate([local_e, global_e], axis=1)


def _reference(hiddens, labels, predicted, bias1_w, bias2_w):
    """Pure-JAX (f32) reference of the PyTorch forward pass."""
    local = hiddens + bias1_w[labels] + bias2_w[predicted]
    s = (local @ local.T) / math.sqrt(local.shape[-1])
    p = jax.nn.softmax(s, axis=-1)
    glob = p @ local
    return jnp.concatenate([local, glob], axis=1)


if __name__ == "__main__":
    key = jax.random.PRNGKey(0)
    k_h, k_l, k_p, k_b1, k_b2 = jax.random.split(key, 5)

    L, H = 8, 32          # small seq-len / hidden (module default size=768)
    ACTION_SIZE = 3

    hiddens = jax.random.normal(k_h, (L, H), dtype=jnp.float32)
    labels = jax.random.randint(k_l, (L,), 0, ACTION_SIZE, dtype=jnp.int32)
    predicted = jax.random.randint(k_p, (L,), 0, 2, dtype=jnp.int32)

    # nn.Embedding weights, init uniform_(-1.0, 1.0), deterministic here.
    bias1_w = jax.random.uniform(k_b1, (ACTION_SIZE, 1), jnp.float32, -1.0, 1.0)
    bias2_w = jax.random.uniform(k_b2, (2, 1), jnp.float32, -1.0, 1.0)

    out = local_global_encoder(hiddens, labels, predicted, bias1_w, bias2_w)
    out = jax.block_until_ready(out)

    ref = _reference(hiddens, labels, predicted, bias1_w, bias2_w)
    assert out.shape == (L, 2 * H)
    # local half: pure f32 adds -> tight tolerance
    assert jnp.allclose(out[:, :H], ref[:, :H], atol=1e-5, rtol=1e-5), \
        "local half mismatch vs reference"
    # global half: bf16 MXU operands with f32 accumulation -> looser tolerance
    assert jnp.allclose(out[:, H:], ref[:, H:], atol=1e-1, rtol=1e-1), \
        "global half mismatch vs reference"

    print("KERNEL_OK")
</pallas_src>

<mosaic_0001>
module attributes {stable_mosaic.version = 11 : i64} {
  func.func @_encoder_kernel(%arg0: i32, %arg1: i32, %arg2: memref<8x32xf32, #tpu.memory_space<vmem>>, %arg3: memref<8x1xf32, #tpu.memory_space<vmem>>, %arg4: memref<8x32xf32, #tpu.memory_space<vmem>>, %arg5: memref<8x1xf32, #tpu.memory_space<vmem>>, %arg6: memref<8x32xf32, #tpu.memory_space<vmem>>, %arg7: memref<8x32xf32, #tpu.memory_space<vmem>>, %arg8: memref<8x1xf32, #tpu.memory_space<vmem>>, %arg9: memref<8x1xf32, #tpu.memory_space<vmem>>, %arg10: memref<8x32xf32, #tpu.memory_space<vmem>>) attributes {dimension_semantics = [#tpu.dimension_semantics<parallel>, #tpu.dimension_semantics<arbitrary>], iteration_bounds = array<i64: 1, 1>, scalar_prefetch = 0 : i64, scratch_operands = 3 : i64, tpu.core_type = #tpu.core_type<tc>, window_params = [{transform_indices = @transform_0, window_bounds = array<i64: 8, 32>}, {transform_indices = @transform_1, window_bounds = array<i64: 8, 1>}, {transform_indices = @transform_2, window_bounds = array<i64: 8, 32>}, {transform_indices = @transform_3, window_bounds = array<i64: 8, 1>}, {transform_indices = @transform_4, window_bounds = array<i64: 8, 32>}, {transform_indices = @transform_5, window_bounds = array<i64: 8, 32>}]} {
    %c0 = arith.constant 0 : index
    %c0_0 = arith.constant 0 : index
    %0 = vector.load %arg2[%c0, %c0_0] : memref<8x32xf32, #tpu.memory_space<vmem>>, vector<8x32xf32>
    %c0_1 = arith.constant 0 : index
    %c0_2 = arith.constant 0 : index
    %1 = vector.load %arg3[%c0_1, %c0_2] : memref<8x1xf32, #tpu.memory_space<vmem>>, vector<8x1xf32>
    %2 = vector.broadcast %1 : vector<8x1xf32> to vector<8x32xf32>
    %3 = arith.addf %0, %2 : vector<8x32xf32>
    %c0_3 = arith.constant 0 : index
    %c0_4 = arith.constant 0 : index
    %4 = vector.load %arg4[%c0_3, %c0_4] : memref<8x32xf32, #tpu.memory_space<vmem>>, vector<8x32xf32>
    %c0_5 = arith.constant 0 : index
    %c0_6 = arith.constant 0 : index
    %5 = vector.load %arg5[%c0_5, %c0_6] : memref<8x1xf32, #tpu.memory_space<vmem>>, vector<8x1xf32>
    %6 = vector.broadcast %5 : vector<8x1xf32> to vector<8x32xf32>
    %7 = arith.addf %4, %6 : vector<8x32xf32>
    %c0_i32 = arith.constant 0 : i32
    %8 = arith.cmpi eq, %arg1, %c0_i32 : i32
    %9 = arith.extui %8 : i1 to i32
    %c0_i32_7 = arith.constant 0 : i32
    %10 = arith.cmpi ne, %9, %c0_i32_7 : i32
    scf.if %10 {
      %cst_26 = arith.constant 0xFF800000 : f32
      %42 = vector.broadcast %cst_26 : f32 to vector<8x1xf32>
      %c0_27 = arith.constant 0 : index
      %c0_28 = arith.constant 0 : index
      %43 = vector.load %arg8[%c0_27, %c0_28] : memref<8x1xf32, #tpu.memory_space<vmem>>, vector<8x1xf32>
      tpu.vector_store %arg8[%c0_27, %c0_28], %42 {strides = array<i32>} : memref<8x1xf32, #tpu.memory_space<vmem>>, vector<8x1xf32>,
      %cst_29 = arith.constant 0.000000e+00 : f32
      %44 = vector.broadcast %cst_29 : f32 to vector<8x1xf32>
      %c0_30 = arith.constant 0 : index
      %c0_31 = arith.constant 0 : index
      %45 = vector.load %arg9[%c0_30, %c0_31] : memref<8x1xf32, #tpu.memory_space<vmem>>, vector<8x1xf32>
      tpu.vector_store %arg9[%c0_30, %c0_31], %44 {strides = array<i32>} : memref<8x1xf32, #tpu.memory_space<vmem>>, vector<8x1xf32>,
      %cst_32 = arith.constant 0.000000e+00 : f32
      %46 = vector.broadcast %cst_32 : f32 to vector<8x32xf32>
      %c0_33 = arith.constant 0 : index
      %c0_34 = arith.constant 0 : index
      %47 = vector.load %arg10[%c0_33, %c0_34] : memref<8x32xf32, #tpu.memory_space<vmem>>, vector<8x32xf32>
      tpu.vector_store %arg10[%c0_33, %c0_34], %46 {strides = array<i32>} : memref<8x32xf32, #tpu.memory_space<vmem>>, vector<8x32xf32>,
      %c0_35 = arith.constant 0 : index
      %c0_36 = arith.constant 0 : index
      %48 = vector.load %arg6[%c0_35, %c0_36] : memref<8x32xf32, #tpu.memory_space<vmem>>, vector<8x32xf32>
      tpu.vector_store %arg6[%c0_35, %c0_36], %3 {strides = array<i32>} : memref<8x32xf32, #tpu.memory_space<vmem>>, vector<8x32xf32>,
    } else {
    }
    %cst = arith.constant 0.176776692 : f32
    %11 = vector.broadcast %cst : f32 to vector<8x32xf32>
    %12 = arith.mulf %3, %11 : vector<8x32xf32>
    %13 = arith.truncf %12 : vector<8x32xf32> to vector<8x32xbf16>
    %14 = arith.truncf %7 : vector<8x32xf32> to vector<8x32xbf16>
    %cst_8 = arith.constant dense<0.000000e+00> : vector<8x8xf32>
    %15 = tpu.matmul %13, %14, %cst_8 {dimension_numbers = #tpu.dot_dimension_numbers<[1], [1], [0], [0], [0, 0, 1, 0], [], []>} : vector<8x32xbf16>, vector<8x32xbf16>, vector<8x8xf32> -> vector<8x8xf32>
    %c0_9 = arith.constant 0 : index
    %c0_10 = arith.constant 0 : index
    %16 = vector.load %arg8[%c0_9, %c0_10] : memref<8x1xf32, #tpu.memory_space<vmem>>, vector<8x1xf32>
    %cst_11 = arith.constant dense<0xFF800000> : vector<8xf32>
    %17 = vector.multi_reduction <maximumf>, %15, %cst_11 [1] : vector<8x8xf32> to vector<8xf32>
    %18 = vector.shape_cast %17 : vector<8xf32> to vector<8x1xf32>
    %19 = arith.maximumf %16, %18 : vector<8x1xf32>
    %20 = arith.subf %16, %19 : vector<8x1xf32>
    %21 = math.exp %20 : vector<8x1xf32>
    %22 = vector.broadcast %19 : vector<8x1xf32> to vector<8x8xf32>
    %23 = arith.subf %15, %22 : vector<8x8xf32>
    %24 = math.exp %23 : vector<8x8xf32>
    %c0_12 = arith.constant 0 : index
    %c0_13 = arith.constant 0 : index
    %25 = vector.load %arg9[%c0_12, %c0_13] : memref<8x1xf32, #tpu.memory_space<vmem>>, vector<8x1xf32>
    %26 = arith.mulf %21, %25 : vector<8x1xf32>
    %cst_14 = arith.constant dense<0.000000e+00> : vector<8xf32>
    %27 = vector.multi_reduction <add>, %24, %cst_14 [1] : vector<8x8xf32> to vector<8xf32>
    %28 = vector.shape_cast %27 : vector<8xf32> to vector<8x1xf32>
    %29 = arith.addf %26, %28 : vector<8x1xf32>
    %c0_15 = arith.constant 0 : index
    %c0_16 = arith.constant 0 : index
    %30 = vector.load %arg9[%c0_15, %c0_16] : memref<8x1xf32, #tpu.memory_space<vmem>>, vector<8x1xf32>
    tpu.vector_store %arg9[%c0_15, %c0_16], %29 {strides = array<i32>} : memref<8x1xf32, #tpu.memory_space<vmem>>, vector<8x1xf32>,
    %c0_17 = arith.constant 0 : index
    %c0_18 = arith.constant 0 : index
    %31 = vector.load %arg10[%c0_17, %c0_18] : memref<8x32xf32, #tpu.memory_space<vmem>>, vector<8x32xf32>
    %32 = vector.broadcast %21 : vector<8x1xf32> to vector<8x32xf32>
    %33 = arith.mulf %32, %31 : vector<8x32xf32>
    %34 = arith.truncf %24 : vector<8x8xf32> to vector<8x8xbf16>
    %cst_19 = arith.constant dense<0.000000e+00> : vector<8x32xf32>
    %35 = tpu.matmul %34, %14, %cst_19 {dimension_numbers = #tpu.dot_dimension_numbers<[1], [0], [0], [1], [0, 0, 1, 1], [], []>} : vector<8x8xbf16>, vector<8x32xbf16>, vector<8x32xf32> -> vector<8x32xf32>
    %36 = arith.addf %33, %35 : vector<8x32xf32>
    %c0_20 = arith.constant 0 : index
    %c0_21 = arith.constant 0 : index
    %37 = vector.load %arg10[%c0_20, %c0_21] : memref<8x32xf32, #tpu.memory_space<vmem>>, vector<8x32xf32>
    tpu.vector_store %arg10[%c0_20, %c0_21], %36 {strides = array<i32>} : memref<8x32xf32, #tpu.memory_space<vmem>>, vector<8x32xf32>,
    %c0_22 = arith.constant 0 : index
    %c0_23 = arith.constant 0 : index
    %38 = vector.load %arg8[%c0_22, %c0_23] : memref<8x1xf32, #tpu.memory_space<vmem>>, vector<8x1xf32>
    tpu.vector_store %arg8[%c0_22, %c0_23], %19 {strides = array<i32>} : memref<8x1xf32, #tpu.memory_space<vmem>>, vector<8x1xf32>,
    %c0_i32_24 = arith.constant 0 : i32
    %39 = arith.cmpi eq, %arg1, %c0_i32_24 : i32
    %40 = arith.extui %39 : i1 to i32
    %c0_i32_25 = arith.constant 0 : i32
    %41 = arith.cmpi ne, %40, %c0_i32_25 : i32
    scf.if %41 {
      %c0_26 = arith.constant 0 : index
      %c0_27 = arith.constant 0 : index
      %42 = vector.load %arg10[%c0_26, %c0_27] : memref<8x32xf32, #tpu.memory_space<vmem>>, vector<8x32xf32>
      %c0_28 = arith.constant 0 : index
      %c0_29 = arith.constant 0 : index
      %43 = vector.load %arg9[%c0_28, %c0_29] : memref<8x1xf32, #tpu.memory_space<vmem>>, vector<8x1xf32>
      %44 = tpu.reciprocal %43 {approx = true} : vector<8x1xf32> -> vector<8x1xf32>
      %45 = vector.broadcast %44 : vector<8x1xf32> to vector<8x32xf32>
      %46 = arith.mulf %42, %45 : vector<8x32xf32>
      %c0_30 = arith.constant 0 : index
      %c0_31 = arith.constant 0 : index
      %47 = vector.load %arg7[%c0_30, %c0_31] : memref<8x32xf32, #tpu.memory_space<vmem>>, vector<8x32xf32>
      tpu.vector_store %arg7[%c0_30, %c0_31], %46 {strides = array<i32>} : memref<8x32xf32, #tpu.memory_space<vmem>>, vector<8x32xf32>,
    } else {
    }
    return
  }
  func.func @transform_0(%arg0: i32, %arg1: i32) -> (i32, i32) {
    %c0_i32 = arith.constant 0 : i32
    %c0_i32_0 = arith.constant 0 : i32
    return %arg0, %c0_i32 : i32, i32
  }
  func.func @transform_1(%arg0: i32, %arg1: i32) -> (i32, i32) {
    %c0_i32 = arith.constant 0 : i32
    %c0_i32_0 = arith.constant 0 : i32
    return %arg0, %c0_i32 : i32, i32
  }
  func.func @transform_2(%arg0: i32, %arg1: i32) -> (i32, i32) {
    %c0_i32 = arith.constant 0 : i32
    %c0_i32_0 = arith.constant 0 : i32
    return %arg1, %c0_i32 : i32, i32
  }
  func.func @transform_3(%arg0: i32, %arg1: i32) -> (i32, i32) {
    %c0_i32 = arith.constant 0 : i32
    %c0_i32_0 = arith.constant 0 : i32
    return %arg1, %c0_i32 : i32, i32
  }
  func.func @transform_4(%arg0: i32, %arg1: i32) -> (i32, i32) {
    %c0_i32 = arith.constant 0 : i32
    %c0_i32_0 = arith.constant 0 : i32
    return %arg0, %c0_i32 : i32, i32
  }
  func.func @transform_5(%arg0: i32, %arg1: i32) -> (i32, i32) {
    %c0_i32 = arith.constant 0 : i32
    %c0_i32_0 = arith.constant 0 : i32
    return %arg0, %c0_i32 : i32, i32
  }
}

</mosaic_0001>

<bundles_post_ra>
// kernel: tpu_custom_call.1
= control target key start
LH: loop header
LB: loop body
LE: loop exit
PB: predicated region body
PF: predicated region fallthrough
CT: control target
= control target key end

     0   :  { %11 = vsyncpa [#allocation6], 0  ;;  %v297_v1 = vmov 0   ;;  %vm45_vm0 = vcmask 261120   ;;  %s364_s0 = inlined_call_operand.vmem [shape: f32[8,32], index: 0, kind: input, shape index: {}]   ;;  %s365_s1 = inlined_call_operand.vmem [shape: f32[8,1], index: 1, kind: input, shape index: {}]   ;;  %s366_s2 = inlined_call_operand.vmem [shape: f32[8,32], index: 2, kind: input, shape index: {}]   ;;  %s367_s3 = inlined_call_operand.vmem [shape: f32[8,1], index: 3, kind: input, shape index: {}]   ;;  %s368_s4 = inlined_call_operand.hbm [shape: f32[8,32], index: 4, kind: output, shape index: {0}]   ;;  %s369_s5 = inlined_call_operand.hbm [shape: f32[8,32], index: 5, kind: output, shape index: {1}]  }
   0x1   :  { %v31_v0 = vld [vmem:[%s367_s3] sm:$0xff]  ;;  %245 = vset.pattern.permute.xlu0 %v297_v1  ;;  %246 = vset.pattern.permute.xlu1 %v297_v1 }
   0x2   :  { %12 = vsyncpa [#allocation8], 0  ;;  %34 = vperm.xlu0 %245, %v31_v0   ;;  %v298_v2 = vmov 0.0   ;;  %v23_v3 = vld [vmem:[%s365_s1] sm:$0xff]  ;;  %vm299_vm1 = vmmov 0   ;;  %vm134_vm2 = vcmask 1043456  }
   0x3   :  { %227 = vmatprep.subr.bf16.mxu0 %v298_v2  ;;  %46 = vst.msk [vmem:[#allocation4] sm:$0xff] %vm45_vm0, %v298_v2  ;;  %233 = vmatprep.subr.bf16.mxu1 %v298_v2  ;;  %v30_v4 = vld [vmem:[%s366_s2] sm:$0xff]  ;;  %vm42_vm3 = vcmask 7168   ;;  %v300_v15 = vmov -inf   ;;  %vm99_vm4 = vcmask 64512  }
   0x4   :  { %229 = vmatprep.mubr.msk.bf16.mxu0 %vm299_vm1, %v298_v2  ;;  %235 = vmatprep.mubr.msk.bf16.mxu1 %vm299_vm1, %v298_v2  ;;  %v22_v7 = vld [vmem:[%s364_s0] sm:$0xff]  ;;  %43 = vst.msk [vmem:[#allocation2] sm:$0xff] %vm42_vm3, %v300_v15  ;;  %44 = vst.msk [vmem:[#allocation3] sm:$0xff] %vm42_vm3, %v298_v2  ;;  %s301_s0 = smov [#allocation5]  }
   0x5   :  { %s199_s1 = sshll.u32 %s301_s0, 4  ;;  %s200_s1 = int_to_ptr.vmem [resolvable:$true] %s199_s1 }
   0x6   :  { %26 = vperm.xlu0 %245, %v23_v3   ;;  %s253_s2 = scalar_lea.vmem %s200_s1, 128  ;;  %p258_p1 = scmp.lt.s32.totalorder %s200_s1, %s200_s1 }
   0x7   :  { %p254_p0 = scmp.ne.s32.totalorder %s200_s1, %s253_s2  ;;  %p259_p2 = scmp.lt.s32.totalorder %s253_s2, %s253_s2 }
   0x9   :  { %p260_p3 = por %p259_p2, %p258_p1 }
   0xb   :  { %v98_v21 = vld [vmem:[#allocation2] sm:$0xff]  ;;  %v115_v33 = vld [vmem:[#allocation3] sm:$0xff]  ;;  %p261_p4 = pnand %p260_p3, %p254_p0 }
  0x7d   :  { %v35_v5 = vpop.permute.xlu0 %34 }
  0x7e   :  { %v37_v6 = vadd.f32 %v35_v5, %v30_v4 }
  0x80   :  { %v50_v8 = vpack.c.bf16 %v37_v6, %v37_v6 }
  0x81   :  { %v27_v9 = vpop.permute.xlu0 %26 }
  0x82   :  { %v29_v10 = vadd.f32 %v27_v9, %v22_v7  ;;  %v56_v11 = vsel %vm45_vm0, %v50_v8, 0  ;;  %v135_v12 = vsel %vm134_vm2, %v50_v8, 0 }
  0x83   :  { %228 = vmatpush3.bf16.xpose.msra.mxu0 %v56_v11  ;;  %234 = vmatpush3.bf16.msra.mxu1 %v135_v12 }
  0x84   :  { %v48_v13 = vmul.f32 0.17677669, %v29_v10  ;;  %47 = vst.msk [vmem:[#allocation5] sm:$0xff] %vm45_vm0, %v29_v10 }
  0x86   :  { %v49_v14 = vpack.c.bf16 %v48_v13, %v48_v13 }
  0x8a   :  { %230 = vmatmul.mubr.msk.bf16.vlgmr.msra.gmra.mxu0 %vm45_vm0, %v49_v14 }
 0x14a   :  { %v92_v16 = vpop.f32.mrf.mxu0 }
 0x14b   :  { %v100_v17 = vsel %vm99_vm4, %v92_v16, -inf }
 0x14c   :  { %101 = vmax.xlane.f32.xlu1 %v100_v17  ;;  %v231_v18 = vpop.f32.mrf.mxu0 }
 0x14e   :  { %v95_v19 = vpop.f32.mrf.mxu0 }
 0x150   :  { %v232_v20 = vpop.f32.mrf.mxu0 }
 0x1d5   :  { %v102_v22 = vpop.xlane.xlu1 %101 }
 0x1d6   :  { %v103_v23 = vmax.f32 %v98_v21, %v102_v22 }
 0x1d8   :  { %v104_v24 = vsub.f32 %v98_v21, %v103_v23  ;;  %179 = vst.msk [vmem:[#allocation2] sm:$0xff] %vm42_vm3, %v103_v23  ;;  %109 = vperm.xlu1 %246, %v103_v23  }
 0x1da   :  { %v105_v25 = vmul.f32 1.442695, %v104_v24 }
 0x1dc   :  { %247 = vpow2.f32 %v105_v25 }
 0x1e9   :  { %v248_v26 = vpop.eup %247 }
 0x1ea   :  { %126 = vperm.xlu1 %246, %v248_v26   ;;  %v116_v34 = vmul.f32 %v248_v26, %v115_v33 }
 0x253   :  { %v110_v27 = vpop.permute.xlu1 %109 }
 0x254   :  { %v112_v28 = vsub.f32 %v92_v16, %v110_v27 }
 0x256   :  { %v113_v29 = vmul.f32 1.442695, %v112_v28 }
 0x258   :  { %249 = vpow2.f32 %v113_v29 }
 0x265   :  { %v250_v30 = vpop.eup %249 }
 0x266   :  { %v117_v31 = vsel %vm99_vm4, %v250_v30, 0.0  ;;  %v130_v32 = vpack.c.bf16 %v250_v30, %v250_v30 }
 0x267   :  { %118 = vadd.xlane.f32.xlu0 %v117_v31 }
 0x268   :  { %236 = vmatmul.mubr.msk.bf16.vlgmr.msra.gmra.mxu1 %vm99_vm4, %v130_v32 }
 0x2f0   :  { %v119_v35 = vpop.xlane.xlu0 %118 }
 0x2f1   :  { %v120_v36 = vadd.f32 %v119_v35, %v116_v34 }
 0x2f3   :  { %122 = vst.msk [vmem:[#allocation3] sm:$0xff] %vm42_vm3, %v120_v36 }
 0x2fa   :  { %v184_v37 = vld [vmem:[#allocation3] sm:$0xff] }
 0x2fb   :  { %251 = vrcp.f32 %v184_v37 }
 0x308   :  { %v252_v38 = vpop.eup %251 }
 0x309   :  { %264 = shalt.err (!%p261_p4)
}
 0x30a   :  { %202 = dma.vmem_to_hbm [thread:$0]  %s200_s1, 128, %s368_s4, [#allocation6]   ;;  %188 = vperm.xlu1 %246, %v252_v38   ;;  %v123_v39 = vld [vmem:[#allocation4] sm:$0xff]  ;;  %v127_v40 = vpop.permute.xlu1 %126 }
 0x30b   :  { %v129_v41 = vmul.f32 %v127_v40, %v123_v39  ;;  %s302_s27 = smov [#allocation7]  }
 0x30c   :  { %s209_s28 = sshll.u32 %s302_s27, 4  ;;  %s210_s28 = int_to_ptr.vmem [resolvable:$true] %s209_s28 }
 0x30d   :  { %s273_s4 = scalar_lea.vmem %s210_s28, 128  ;;  %p278_p6 = scmp.lt.s32.totalorder %s210_s28, %s210_s28 }
 0x30e   :  { %p274_p5 = scmp.ne.s32.totalorder %s210_s28, %s273_s4  ;;  %p279_p7 = scmp.lt.s32.totalorder %s273_s4, %s273_s4 }
 0x310   :  { %p280_p8 = por %p279_p7, %p278_p6 }
 0x312   :  { %p281_p9 = pnand %p280_p8, %p274_p5 }
 0x328   :  { %v171_v42 = vpop.f32.mrf.mxu1 }
 0x329   :  { %v177_v43 = vadd.f32 %v171_v42, %v129_v41 }
 0x32a   :  { %v237_v44 = vpop.f32.mrf.mxu1 }
 0x32b   :  { %178 = vst.msk [vmem:[#allocation4] sm:$0xff] %vm45_vm0, %v177_v43 }
 0x32c   :  { %v174_v45 = vpop.f32.mrf.mxu1 }
 0x32e   :  { %v238_v46 = vpop.f32.mrf.mxu1 }
 0x332   :  { %v183_v47 = vld [vmem:[#allocation4] sm:$0xff] }
 0x385   :  { %v189_v48 = vpop.permute.xlu1 %188 }
 0x386   :  { %v191_v49 = vmul.f32 %v189_v48, %v183_v47 }
 0x388   :  { %192 = vst.msk [vmem:[#allocation7] sm:$0xff] %vm45_vm0, %v191_v49 }
 0x389   :  { %284 = shalt.err (!%p281_p9)
}
 0x38a   :  { %212 = dma.vmem_to_hbm [thread:$0]  %s210_s28, 128, %s369_s5, [#allocation8]  }
 0x38b   :  { %293 = dma.done.wait [#allocation6], 128  }
 0x38c   :  { %294 = vsyncadd [#allocation6], 4294967168 }
 0x38d   :  { %295 = dma.done.wait [#allocation8], 128  }
 0x38e   :  { %296 = vsyncadd [#allocation8], 4294967168 }
 0x38f   :  { %219 = vsyncpa [#allocation6], 1 }
 0x390   :  { %220 = vsyncpa [#allocation8], 1 }

</bundles_post_ra>
